<compile_context>
chip_gen: v6e
topology: v6e:2x2x1
jax: 0.10.0
libtpu: 0.0.40
codegen_flags: <defaults>
</compile_context>

<pallas_src>
import functools

import jax
import jax.numpy as jnp
from jax.experimental import pallas as pl
from jax.experimental.pallas import tpu as pltpu


def _one_hot_ce_kernel(x_ref, y_ref, out_ref, acc_ref, *,
                       num_classes, batch, block_b, feat):
    i = pl.program_id(0)
    n = pl.num_programs(0)

    @pl.when(i == 0)
    def _init():
        acc_ref[0] = jnp.float32(0.0)

    x = x_ref[...].astype(jnp.float32)
    y = y_ref[...].astype(jnp.float32)

    prod = y * jnp.log(x + 1e-07)          # EUP log + VPU mul

    # Only the first 2*C columns contribute; mask (instead of slicing mid-vreg)
    # when the feature dim carries extra unused columns.
    if feat != 2 * num_classes:
        col = jax.lax.broadcasted_iota(jnp.int32, prod.shape, 1)
        prod = jnp.where(col < 2 * num_classes, prod, 0.0)

    # Ragged last batch tile: zero out rows beyond the true batch size.
    if batch % block_b != 0:
        row = jax.lax.broadcasted_iota(jnp.int32, prod.shape, 0) + i * block_b
        prod = jnp.where(row < batch, prod, 0.0)

    # Single fused reduction per tile, accumulated in SMEM across grid steps.
    acc_ref[0] += jnp.sum(prod)

    @pl.when(i == n - 1)
    def _finalize():
        # Divide by the GLOBAL batch size (not the per-tile row count).
        out_ref[0] = acc_ref[0] * jnp.float32(-1.0 / batch)


def one_hot_cross_entropy(x, y, num_classes, *, block_b=None):
    """Pallas TPU implementation of one_hot_CrossEntropy.forward.

    x, y: [B, F] arrays with F >= 2 * num_classes. Returns a scalar f32.
    num_classes must be a static Python int.
    """
    assert x.shape == y.shape
    B, F = x.shape
    assert F >= 2 * num_classes

    itemsize = jnp.dtype(x.dtype).itemsize
    # Min sublane multiple per dtype packing: f32 -> 8, bf16 -> 16, int8 -> 32.
    sublane = max(8, 32 // max(itemsize, 1))

    if block_b is None:
        # 2 inputs x 2 pipeline buffers x TB x F x itemsize <= ~8 MiB
        # (safe under v5e's 16 MiB scoped-VMEM default and v7x's 64 MiB VMEM).
        budget = 8 * 1024 * 1024
        tb = budget // (4 * F * itemsize)
        tb = max(sublane, (tb // sublane) * sublane)
        tb = min(tb, 1024)
        block_b = B if B <= tb else tb
    else:
        block_b = min(block_b, B)
        if block_b < B and block_b % sublane != 0:
            block_b = max(sublane, (block_b // sublane) * sublane)

    grid = (pl.cdiv(B, block_b),)

    kernel = functools.partial(
        _one_hot_ce_kernel,
        num_classes=num_classes, batch=B, block_b=block_b, feat=F)

    out = pl.pallas_call(
        kernel,
        out_shape=jax.ShapeDtypeStruct((1,), jnp.float32),
        grid=grid,
        in_specs=[
            pl.BlockSpec((block_b, F), lambda i: (i, 0)),
            pl.BlockSpec((block_b, F), lambda i: (i, 0)),
        ],
        # Scalar result lives in SMEM (no padded (1,1) VMEM output tile).
        out_specs=pl.BlockSpec(memory_space=pltpu.MemorySpace.SMEM),
        scratch_shapes=[pltpu.SMEM((1,), jnp.float32)],
        compiler_params=pltpu.CompilerParams(
            dimension_semantics=("arbitrary",)),   # running-sum reduction axis
    )(x, y)
    return out[0]


def _reference(x, y, num_classes):
    c = num_classes
    x = x.astype(jnp.float32)
    y = y.astype(jnp.float32)
    la = -jnp.mean(jnp.sum(y[:, :c] * jnp.log(x[:, :c] + 1e-07), axis=1), axis=0)
    lb = -jnp.mean(jnp.sum(y[:, c:2 * c] * jnp.log(x[:, c:2 * c] + 1e-07), axis=1),
                   axis=0)
    return la + lb


if __name__ == "__main__":
    key = jax.random.PRNGKey(0)
    k_x, k_ya, k_yb, k_pad = jax.random.split(key, 4)

    B = 24
    num_classes = 10
    F = 2 * num_classes  # two probability blocks, packed contiguously

    # x: positive "probabilities", split into two softmaxed halves.
    logits = jax.random.normal(k_x, (B, F), dtype=jnp.float32)
    x = jnp.concatenate(
        [jax.nn.softmax(logits[:, :num_classes], axis=1),
         jax.nn.softmax(logits[:, num_classes:], axis=1)], axis=1)

    # y: one-hot targets in each half.
    labels_a = jax.random.randint(k_ya, (B,), 0, num_classes)
    labels_b = jax.random.randint(k_yb, (B,), 0, num_classes)
    y = jnp.concatenate(
        [jax.nn.one_hot(labels_a, num_classes, dtype=jnp.float32),
         jax.nn.one_hot(labels_b, num_classes, dtype=jnp.float32)], axis=1)

    ref = _reference(x, y, num_classes)

    # Default (auto) tiling: small shapes -> single tile.
    loss = jax.block_until_ready(one_hot_cross_entropy(x, y, num_classes))
    assert jnp.allclose(loss, ref, atol=1e-5, rtol=1e-5), (loss, ref)

    # Multi-tile path with a ragged last tile (24 = 16 + 8): exercises the
    # SMEM running-sum accumulator and the row mask.
    loss_t = jax.block_until_ready(
        one_hot_cross_entropy(x, y, num_classes, block_b=16))
    assert jnp.allclose(loss_t, ref, atol=1e-5, rtol=1e-5), (loss_t, ref)

    # F > 2*C path: trailing unused columns must be ignored (column mask).
    F2 = 32
    extra_x = jnp.abs(jax.random.normal(k_pad, (B, F2 - F), dtype=jnp.float32)) + 0.1
    extra_y = jnp.ones((B, F2 - F), dtype=jnp.float32)
    x2 = jnp.concatenate([x, extra_x], axis=1)
    y2 = jnp.concatenate([y, extra_y], axis=1)
    ref2 = _reference(x2, y2, num_classes)
    loss2 = jax.block_until_ready(one_hot_cross_entropy(x2, y2, num_classes))
    assert jnp.allclose(loss2, ref2, atol=1e-5, rtol=1e-5), (loss2, ref2)

    print("KERNEL_OK")
</pallas_src>

<mosaic_0001>
module attributes {stable_mosaic.version = 11 : i64} {
  func.func @_one_hot_ce_kernel(%arg0: i32, %arg1: memref<24x20xf32, #tpu.memory_space<vmem>>, %arg2: memref<24x20xf32, #tpu.memory_space<vmem>>, %arg3: memref<1xf32, #tpu.memory_space<smem>>, %arg4: memref<1xf32, #tpu.memory_space<smem>>) attributes {dimension_semantics = [#tpu.dimension_semantics<arbitrary>], iteration_bounds = array<i64: 1>, scalar_prefetch = 0 : i64, scratch_operands = 1 : i64, tpu.core_type = #tpu.core_type<tc>, window_params = [{transform_indices = @transform_0, window_bounds = array<i64: 24, 20>}, {transform_indices = @transform_1, window_bounds = array<i64: 24, 20>}, {transform_indices = @transform_2, window_bounds = array<i64: 1>}]} {
    %c0_i32 = arith.constant 0 : i32
    %0 = arith.cmpi eq, %arg0, %c0_i32 : i32
    %1 = arith.extui %0 : i1 to i32
    %c0_i32_0 = arith.constant 0 : i32
    %2 = arith.cmpi ne, %1, %c0_i32_0 : i32
    scf.if %2 {
      %cst_9 = arith.constant 0.000000e+00 : f32
      %c0_10 = arith.constant 0 : index
      %19 = memref.load %arg4[%c0_10] : memref<1xf32, #tpu.memory_space<smem>>
      memref.store %cst_9, %arg4[%c0_10] : memref<1xf32, #tpu.memory_space<smem>>
    } else {
    }
    %c0 = arith.constant 0 : index
    %c0_1 = arith.constant 0 : index
    %3 = vector.load %arg1[%c0, %c0_1] : memref<24x20xf32, #tpu.memory_space<vmem>>, vector<24x20xf32>
    %c0_2 = arith.constant 0 : index
    %c0_3 = arith.constant 0 : index
    %4 = vector.load %arg2[%c0_2, %c0_3] : memref<24x20xf32, #tpu.memory_space<vmem>>, vector<24x20xf32>
    %cst = arith.constant 1.000000e-07 : f32
    %5 = vector.broadcast %cst : f32 to vector<24x20xf32>
    %6 = arith.addf %3, %5 : vector<24x20xf32>
    %7 = math.log %6 : vector<24x20xf32>
    %8 = arith.mulf %4, %7 : vector<24x20xf32>
    %c0_4 = arith.constant 0 : index
    %9 = memref.load %arg4[%c0_4] : memref<1xf32, #tpu.memory_space<smem>>
    %10 = vector.shape_cast %8 : vector<24x20xf32> to vector<1x24x20xf32>
    %cst_5 = arith.constant dense<0.000000e+00> : vector<1xf32>
    %11 = vector.multi_reduction <add>, %10, %cst_5 [1, 2] : vector<1x24x20xf32> to vector<1xf32>
    %12 = vector.shape_cast %11 : vector<1xf32> to vector<1x1x1xf32>
    %13 = vector.extract %12[0, 0, 0] : f32 from vector<1x1x1xf32>
    %14 = arith.addf %9, %13 : f32
    %c0_6 = arith.constant 0 : index
    %15 = memref.load %arg4[%c0_6] : memref<1xf32, #tpu.memory_space<smem>>
    memref.store %14, %arg4[%c0_6] : memref<1xf32, #tpu.memory_space<smem>>
    %c0_i32_7 = arith.constant 0 : i32
    %16 = arith.cmpi eq, %arg0, %c0_i32_7 : i32
    %17 = arith.extui %16 : i1 to i32
    %c0_i32_8 = arith.constant 0 : i32
    %18 = arith.cmpi ne, %17, %c0_i32_8 : i32
    scf.if %18 {
      %c0_9 = arith.constant 0 : index
      %19 = memref.load %arg4[%c0_9] : memref<1xf32, #tpu.memory_space<smem>>
      %cst_10 = arith.constant -0.0416666679 : f32
      %20 = arith.mulf %19, %cst_10 : f32
      %c0_11 = arith.constant 0 : index
      %21 = memref.load %arg3[%c0_11] : memref<1xf32, #tpu.memory_space<smem>>
      memref.store %20, %arg3[%c0_11] : memref<1xf32, #tpu.memory_space<smem>>
    } else {
    }
    return
  }
  func.func @transform_0(%arg0: i32) -> (i32, i32) {
    %c0_i32 = arith.constant 0 : i32
    %c0_i32_0 = arith.constant 0 : i32
    return %arg0, %c0_i32 : i32, i32
  }
  func.func @transform_1(%arg0: i32) -> (i32, i32) {
    %c0_i32 = arith.constant 0 : i32
    %c0_i32_0 = arith.constant 0 : i32
    return %arg0, %c0_i32 : i32, i32
  }
  func.func @transform_2(%arg0: i32) -> i32 {
    %c0_i32 = arith.constant 0 : i32
    %c0_i32_0 = arith.constant 0 : i32
    return %c0_i32 : i32
  }
}

</mosaic_0001>

<bundles_post_ra>
// kernel: tpu_custom_call.1
= control target key start
LH: loop header
LB: loop body
LE: loop exit
PB: predicated region body
PF: predicated region fallthrough
CT: control target
= control target key end

     0   :  { %7 = vsyncpa [#allocation4], 0  ;;  %s201_s0 = inlined_call_operand.hbm [shape: f32[24,20], index: 0, kind: input, shape index: {}]   ;;  %s202_s1 = inlined_call_operand.hbm [shape: f32[24,20], index: 1, kind: input, shape index: {}]   ;;  %s203_s2 = inlined_call_operand.hbm [shape: f32[1], index: 2, kind: output, shape index: {}]  }
   0x1   :  { %8 = vsyncpa [#allocation7], 0 }
   0x2   :  { %9 = vsyncpa [#allocation5], 0  ;;  %s172_s9 = smov [#allocation3]  }
   0x3   :  { %s15_s10 = sshll.u32 %s172_s9, 4  ;;  %s16_s10 = int_to_ptr.vmem [resolvable:$true] %s15_s10 }
   0x4   :  { %s126_s11 = scalar_lea.vmem %s16_s10, 384  ;;  %p131_p1 = scmp.lt.s32.totalorder %s16_s10, %s16_s10 }
   0x5   :  { %p127_p0 = scmp.ne.s32.totalorder %s16_s10, %s126_s11  ;;  %p132_p2 = scmp.lt.s32.totalorder %s126_s11, %s126_s11 }
   0x7   :  { %p133_p3 = por %p132_p2, %p131_p1 }
   0x9   :  { %p134_p4 = pnand %p133_p3, %p127_p0 }
   0xb   :  { %137 = shalt.err (!%p134_p4)
}
   0xc   :  { %s173_s12 = smov 128   ;;  %s174_s13 = smov 8  }
   0xd   :  { %21 = dma.hbm_to_vmem [thread:$0]  %s201_s0, 384, %s16_s10, [#allocation4], %s173_s12, %s173_s12, %s174_s13  }
   0xe   :  { %s175_s16 = smov [#allocation6]  }
   0xf   :  { %s27_s17 = sshll.u32 %s175_s16, 4  ;;  %s28_s17 = int_to_ptr.vmem [resolvable:$true] %s27_s17 }
  0x10   :  { %s146_s18 = scalar_lea.vmem %s28_s17, 384  ;;  %p151_p6 = scmp.lt.s32.totalorder %s28_s17, %s28_s17 }
  0x11   :  { %p147_p5 = scmp.ne.s32.totalorder %s28_s17, %s146_s18  ;;  %p152_p7 = scmp.lt.s32.totalorder %s146_s18, %s146_s18 }
  0x13   :  { %p153_p8 = por %p152_p7, %p151_p6 }
  0x15   :  { %p154_p9 = pnand %p153_p8, %p147_p5 }
  0x17   :  { %157 = shalt.err (!%p154_p9)
}
  0x18   :  { %33 = dma.hbm_to_vmem [thread:$0]  %s202_s1, 384, %s28_s17, [#allocation7], %s173_s12, %s173_s12, %s174_s13  }
  0x19   :  { %166 = dma.done.wait [#allocation4], 384  }
  0x1a   :  { %167 = vsyncadd [#allocation4], 4294966912 }
  0x1b   :  { %168 = dma.done.wait [#allocation7], 384  }
  0x1c   :  { %169 = vsyncadd [#allocation7], 4294966912  ;;  %v46_v0 = vld [vmem:[#allocation3] sm:$0xff]  ;;  %v47_v1 = vld [vmem:[#allocation3 + $0x8] sm:$0xff]  ;;  %vm65_vm0 = vcmask 162816   ;;  %s176_s21 = smov [#allocation8]  }
  0x1d   :  { %v48_v2 = vld [vmem:[#allocation3 + $0x10] sm:$0xff]  ;;  %v52_v3 = vadd.f32 1e-07, %v46_v0  ;;  %v53_v4 = vadd.f32 1e-07, %v47_v1  ;;  %v49_v7 = vld [vmem:[#allocation6] sm:$0xff] }
  0x1e   :  { %v54_v5 = vadd.f32 1e-07, %v48_v2  ;;  %v50_v9 = vld [vmem:[#allocation6 + $0x8] sm:$0xff]  ;;  %v51_v12 = vld [vmem:[#allocation6 + $0x10] sm:$0xff] }
  0x1f   :  { %112 = vlog2.f32 %v52_v3 }
  0x20   :  { %114 = vlog2.f32 %v53_v4 }
  0x21   :  { %116 = vlog2.f32 %v54_v5 }
  0x2c   :  { %v113_v6 = vpop.eup %112 }
  0x2d   :  { %v115_v8 = vpop.eup %114  ;;  %v56_v10 = vmul.f32 0.6931472, %v113_v6 }
  0x2e   :  { %v117_v11 = vpop.eup %116  ;;  %v58_v13 = vmul.f32 0.6931472, %v115_v8 }
  0x2f   :  { %v60_v14 = vmul.f32 0.6931472, %v117_v11  ;;  %v61_v15 = vmul.f32 %v56_v10, %v49_v7 }
  0x30   :  { %v62_v16 = vmul.f32 %v58_v13, %v50_v9 }
  0x31   :  { %v63_v17 = vmul.f32 %v60_v14, %v51_v12  ;;  %v66_v18 = vsel %vm65_vm0, %v61_v15, 0.0 }
  0x32   :  { %v67_v19 = vsel %vm65_vm0, %v62_v16, 0.0 }
  0x33   :  { %v68_v20 = vadd.f32 %v67_v19, %v66_v18  ;;  %v69_v21 = vsel %vm65_vm0, %v63_v17, 0.0 }
  0x35   :  { %v70_v22 = vadd.f32 %v69_v21, %v68_v20 }
  0x37   :  { %71 = vadd.xlane.f32.xlu0 %v70_v22 }
  0xc0   :  { %v72_v23 = vpop.xlane.xlu0 %71 }
  0xc1   :  { %v73_v24 = vrot.slane %v72_v23, 4 }
  0xc3   :  { %v74_v25 = vadd.f32 %v73_v24, %v72_v23 }
  0xc5   :  { %v75_v26 = vrot.slane %v74_v25, 2 }
  0xc7   :  { %v76_v27 = vadd.f32 %v75_v26, %v74_v25 }
  0xc9   :  { %v77_v28 = vrot.slane %v76_v27, 1 }
  0xcb   :  { %v78_v29 = vadd.f32 %v77_v28, %v76_v27 }
  0xcd   :  { %105 = vpush %v78_v29 }
  0xfe   :  { %s106_s0 = spop %105 }
  0xff   :  { %s87_s1 = smul.f32 -0.041666668, %s106_s0 }
 0x101   :  { %89 = sst [smem:[#allocation8]] %s87_s1 }
 0x102   :  { %97 = dma.smem_to_hbm %s176_s21, 16, %s203_s2, [#allocation5]  }
 0x103   :  { %170 = dma.done.wait [#allocation5], 16  }
 0x104   :  { %171 = vsyncadd [#allocation5], 4294967280 }
 0x105   :  { %101 = sfence }
 0x106   :  { %102 = vsyncpa [#allocation4], 1 }
 0x107   :  { %103 = vsyncpa [#allocation7], 1 }
 0x108   :  { %104 = vsyncpa [#allocation5], 1 }

</bundles_post_ra>
